<compile_context>
chip_gen: v7x
topology: tpu7x:2x2x1
jax: 0.10.0
libtpu: 0.0.40
codegen_flags: <defaults>
</compile_context>

<pallas_src>
import functools
import math

import jax
import jax.numpy as jnp
from jax.experimental import pallas as pl
from jax.experimental.pallas import tpu as pltpu


_VMEM_LIMIT = 48 * 1024 * 1024      # <= v7x's 64 MiB physical VMEM; safe on v5e/v6e.
_LAYER_STRIDES = (2, 1)             # first block of each layer downsamples.


def _round_up(x, m):
    return (x + m - 1) // m * m


# ----------------------------------------------------------------------------
# Tiled matmul kernel (im2col convs, shortcuts, all transformer linears)
# ----------------------------------------------------------------------------
def _matmul_kernel(a_ref, b_ref, o_ref, acc_ref):
    @pl.when(pl.program_id(2) == 0)
    def _():
        acc_ref[...] = jnp.zeros_like(acc_ref)

    acc_ref[...] += jnp.dot(a_ref[...], b_ref[...],
                            preferred_element_type=jnp.float32)

    @pl.when(pl.program_id(2) == pl.num_programs(2) - 1)
    def _():
        o_ref[...] = acc_ref[...].astype(o_ref.dtype)


def _matmul_tiles(M, K, N):
    Mp = _round_up(M, 8)
    if Mp <= 512:
        tm = Mp
    else:
        tm = 512
        while Mp % tm:          # largest multiple of 8 (<=512) dividing Mp
            tm -= 8
    Kp = _round_up(K, 8)
    if Kp <= 2048:
        tk = Kp                 # single reduction step, minimal K pad
    else:
        Kp = _round_up(K, 128)
        tk = 1024
        while Kp % tk:
            tk -= 128
    Np = _round_up(N, 128)
    tn = 256 if Np % 256 == 0 else 128   # fill the 256-wide MXU on v6e/v7x
    return Mp, Kp, Np, tm, tk, tn


@jax.jit
def pallas_matmul(a, b):
    """C = A @ B (f32 output); operands cast to bf16, f32 MXU accumulation."""
    M, K = a.shape
    K2, N = b.shape
    assert K == K2
    Mp, Kp, Np, tm, tk, tn = _matmul_tiles(M, K, N)

    a_p = a.astype(jnp.bfloat16)
    if (Mp, Kp) != (M, K):
        a_p = jnp.pad(a_p, ((0, Mp - M), (0, Kp - K)))
    b_p = b.astype(jnp.bfloat16)
    if (Kp, Np) != (K, N):
        b_p = jnp.pad(b_p, ((0, Kp - K), (0, Np - N)))

    out = pl.pallas_call(
        _matmul_kernel,
        out_shape=jax.ShapeDtypeStruct((Mp, Np), jnp.float32),
        grid=(Mp // tm, Np // tn, Kp // tk),
        in_specs=[pl.BlockSpec((tm, tk), lambda i, j, k: (i, k)),
                  pl.BlockSpec((tk, tn), lambda i, j, k: (k, j))],
        out_specs=pl.BlockSpec((tm, tn), lambda i, j, k: (i, j)),
        scratch_shapes=[pltpu.VMEM((tm, tn), jnp.float32)],
        compiler_params=pltpu.CompilerParams(
            dimension_semantics=("parallel", "parallel", "arbitrary"),
            vmem_limit_bytes=_VMEM_LIMIT),
    )(a_p, b_p)
    if (Mp, Np) != (M, N):
        out = out[:M, :N]
    return out


# ----------------------------------------------------------------------------
# Direct 3x3 / stride-1 / pad-1 convolution (no im2col through HBM).
#
# The padded NHWC image is flattened to rows (Hp*Wp, C).  For tap (i, j) the
# A matrix of the tap-matmul is simply the row range starting at i*Wp + j, so
# the conv is 9 shifted matmuls accumulated into the output block in VMEM.
# The pseudo-output has width Wp (the last Wp-Wo columns wrap around the image
# edge and are discarded on the host side).
# ----------------------------------------------------------------------------
def _conv3x3_kernel(x_ref, w_ref, o_ref, *, wp, m_out, kh, kw):
    # x_ref: (L, Cin) bf16 flattened padded image for one batch element
    # w_ref: (kh*kw, Cin, O) bf16 ; o_ref: (m_out, O) f32 pseudo-output
    for t in range(kh * kw):
        i, j = divmod(t, kw)
        off = i * wp + j
        a = x_ref[off:off + m_out, :]
        y = jnp.dot(a, w_ref[t], preferred_element_type=jnp.float32)
        if t == 0:
            o_ref[...] = y
        else:
            o_ref[...] = o_ref[...] + y


@jax.jit
def conv3x3_s1(x_nhwc, w_oihw):
    """3x3, stride 1, padding 1 conv; returns (B*H*W, O) f32."""
    B, H, W, C = x_nhwc.shape
    O, Cin, kh, kw = w_oihw.shape
    assert (kh, kw) == (3, 3) and Cin == C
    Ho, Wo = H, W
    Wp = W + 2
    m_out = Ho * Wp
    # Pad 1 row on top, 2 rows at the bottom (1 halo + 1 slack row so every
    # shifted window stays in bounds), 1 column left/right.
    xp = jnp.pad(x_nhwc.astype(jnp.bfloat16), ((0, 0), (1, 2), (1, 1), (0, 0)))
    l_flat = (H + 3) * Wp
    x_flat = xp.reshape(B, l_flat, C)
    w = jnp.transpose(w_oihw, (2, 3, 1, 0)).reshape(kh * kw, C, O)
    w = w.astype(jnp.bfloat16)

    out = pl.pallas_call(
        functools.partial(_conv3x3_kernel, wp=Wp, m_out=m_out, kh=kh, kw=kw),
        out_shape=jax.ShapeDtypeStruct((B, m_out, O), jnp.float32),
        grid=(B,),
        in_specs=[pl.BlockSpec((None, l_flat, C), lambda b: (b, 0, 0)),
                  pl.BlockSpec((kh * kw, C, O), lambda b: (0, 0, 0))],
        out_specs=pl.BlockSpec((None, m_out, O), lambda b: (b, 0, 0)),
        compiler_params=pltpu.CompilerParams(
            dimension_semantics=("parallel",),
            vmem_limit_bytes=_VMEM_LIMIT),
    )(x_flat, w)
    out = out.reshape(B, Ho, Wp, O)[:, :, :Wo, :]   # drop wrap-around columns
    return out.reshape(B * Ho * Wo, O)


# ----------------------------------------------------------------------------
# im2col fallback (7x7 conv1 and the two stride-2 3x3 convs) in bf16
# ----------------------------------------------------------------------------
def conv2d_im2col(x_nhwc, w_oihw, stride, padding):
    B, H, W, C = x_nhwc.shape
    O, _, kh, kw = w_oihw.shape
    xb = x_nhwc.astype(jnp.bfloat16)
    xp = jnp.pad(xb, ((0, 0), (padding, padding), (padding, padding), (0, 0)))
    Ho = (H + 2 * padding - kh) // stride + 1
    Wo = (W + 2 * padding - kw) // stride + 1
    cols = []
    for i in range(kh):
        for j in range(kw):
            cols.append(xp[:, i:i + stride * Ho:stride, j:j + stride * Wo:stride, :])
    cols = jnp.stack(cols, axis=3).reshape(B * Ho * Wo, kh * kw * C)
    w2d = jnp.transpose(w_oihw, (2, 3, 1, 0)).reshape(kh * kw * C, O)
    w2d = w2d.astype(jnp.bfloat16)
    out = pallas_matmul(cols, w2d)                       # (B*Ho*Wo, O) f32
    return out, Ho, Wo


# ----------------------------------------------------------------------------
# Fused BatchNorm (training-mode batch stats) [+ residual] [+ ReLU] kernels
#   x is (R, C) with R = B*H*W, channels last.
# ----------------------------------------------------------------------------
def _bn_kernel(x_ref, g_ref, b_ref, o_ref, *, relu):
    x = x_ref[...]
    mean = jnp.mean(x, axis=0, keepdims=True)
    var = jnp.mean(jnp.square(x - mean), axis=0, keepdims=True)
    y = (x - mean) * jax.lax.rsqrt(var + 1e-5) * g_ref[...] + b_ref[...]
    if relu:
        y = jnp.maximum(y, 0.0)
    o_ref[...] = y


def _bn_res_kernel(x_ref, r_ref, g_ref, b_ref, o_ref, *, relu):
    x = x_ref[...]
    mean = jnp.mean(x, axis=0, keepdims=True)
    var = jnp.mean(jnp.square(x - mean), axis=0, keepdims=True)
    y = (x - mean) * jax.lax.rsqrt(var + 1e-5) * g_ref[...] + b_ref[...]
    y = y + r_ref[...]
    if relu:
        y = jnp.maximum(y, 0.0)
    o_ref[...] = y


@functools.partial(jax.jit, static_argnames=("relu",))
def pallas_bn(x, gamma, beta, relu=True):
    R, C = x.shape
    return pl.pallas_call(
        functools.partial(_bn_kernel, relu=relu),
        out_shape=jax.ShapeDtypeStruct((R, C), jnp.float32),
        compiler_params=pltpu.CompilerParams(vmem_limit_bytes=_VMEM_LIMIT),
    )(x, gamma.reshape(1, C), beta.reshape(1, C))


@functools.partial(jax.jit, static_argnames=("relu",))
def pallas_bn_res(x, res, gamma, beta, relu=True):
    R, C = x.shape
    return pl.pallas_call(
        functools.partial(_bn_res_kernel, relu=relu),
        out_shape=jax.ShapeDtypeStruct((R, C), jnp.float32),
        compiler_params=pltpu.CompilerParams(vmem_limit_bytes=_VMEM_LIMIT),
    )(x, res, gamma.reshape(1, C), beta.reshape(1, C))


# ----------------------------------------------------------------------------
# Global average pool:  (B, H*W, C) -> (B, C)  (lane-dense output, no transpose)
# ----------------------------------------------------------------------------
def _avgpool_kernel(x_ref, o_ref):
    o_ref[...] = jnp.mean(x_ref[...], axis=1)


@jax.jit
def pallas_avgpool(x3d):
    B, L, C = x3d.shape
    return pl.pallas_call(
        _avgpool_kernel,
        out_shape=jax.ShapeDtypeStruct((B, C), jnp.float32),
        compiler_params=pltpu.CompilerParams(vmem_limit_bytes=_VMEM_LIMIT),
    )(x3d)


# ----------------------------------------------------------------------------
# Fused attention core: all (B*heads) heads in ONE kernel call:
#   scores = q k^T * scale -> softmax -> @ v
# ----------------------------------------------------------------------------
def _attn_kernel(q_ref, k_ref, v_ref, o_ref, *, scale):
    s = jnp.einsum("bqd,bkd->bqk", q_ref[...], k_ref[...],
                   preferred_element_type=jnp.float32) * scale
    s = s - jnp.max(s, axis=-1, keepdims=True)
    p = jnp.exp(s)
    p = p / jnp.sum(p, axis=-1, keepdims=True)
    o_ref[...] = jnp.einsum("bqk,bkd->bqd", p.astype(v_ref.dtype), v_ref[...],
                            preferred_element_type=jnp.float32)


@functools.partial(jax.jit, static_argnames=("scale",))
def pallas_attention(q, k, v, scale):
    G, n, dh = q.shape
    return pl.pallas_call(
        functools.partial(_attn_kernel, scale=scale),
        out_shape=jax.ShapeDtypeStruct((G, n, dh), jnp.float32),
        compiler_params=pltpu.CompilerParams(vmem_limit_bytes=_VMEM_LIMIT),
    )(q, k, v)


# ----------------------------------------------------------------------------
# ResNet BasicBlock
# ----------------------------------------------------------------------------
def basic_block(x_nhwc, p, stride):
    B, H, W, Cin = x_nhwc.shape
    planes = p["conv1_w"].shape[0]
    if stride == 1:
        out = conv3x3_s1(x_nhwc, p["conv1_w"])
        Ho, Wo = H, W
    else:
        out, Ho, Wo = conv2d_im2col(x_nhwc, p["conv1_w"], stride, 1)
    out = pallas_bn(out, p["bn1_g"], p["bn1_b"], relu=True)
    out2 = conv3x3_s1(out.reshape(B, Ho, Wo, planes), p["conv2_w"])
    if "sc_conv_w" in p:
        xs = x_nhwc[:, ::stride, ::stride, :]            # 1x1 conv, pad 0
        sc = pallas_matmul(xs.reshape(B * Ho * Wo, Cin),
                           p["sc_conv_w"].reshape(planes, Cin).T)
        sc = pallas_bn(sc, p["sc_bn_g"], p["sc_bn_b"], relu=False)
    else:
        sc = x_nhwc.reshape(B * H * W, Cin)
    out2 = pallas_bn_res(out2, sc, p["bn2_g"], p["bn2_b"], relu=True)
    return out2.reshape(B, Ho, Wo, planes)


# ----------------------------------------------------------------------------
# Linformer / ViT branch
# ----------------------------------------------------------------------------
def layer_norm(x, g, b, eps=1e-5):
    mu = jnp.mean(x, axis=-1, keepdims=True)
    var = jnp.mean(jnp.square(x - mu), axis=-1, keepdims=True)
    return (x - mu) * jax.lax.rsqrt(var + eps) * g + b


def linformer_attn(x, p, heads, kproj):
    B, n, d = x.shape
    dh = d // heads
    xf = x.reshape(B * n, d)

    qkv = pallas_matmul(xf, p["wqkv"])                   # fused Q/K/V projection
    q = qkv[:, :d].reshape(B, n, d)
    keys = qkv[:, d:2 * d].reshape(B, n, d)
    vals = qkv[:, 2 * d:].reshape(B, n, d)

    # Linformer seq-length projections for K and V in ONE matmul:
    #   einsum('bnd,nk->bkd')  ==  (B*d, n) @ (n, k)
    kv_t = jnp.concatenate(
        [jnp.transpose(keys, (0, 2, 1)).reshape(B * d, n),
         jnp.transpose(vals, (0, 2, 1)).reshape(B * d, n)], axis=0)
    kv_p = pallas_matmul(kv_t, p["proj_kv"])             # (2*B*d, 2*kproj)
    keys = jnp.transpose(kv_p[:B * d, :kproj].reshape(B, d, kproj), (0, 2, 1))
    vals = jnp.transpose(kv_p[B * d:, kproj:].reshape(B, d, kproj), (0, 2, 1))

    qh = q.reshape(B, n, heads, dh).transpose(0, 2, 1, 3).reshape(B * heads, n, dh)
    kh = keys.reshape(B, kproj, heads, dh).transpose(0, 2, 1, 3).reshape(B * heads, kproj, dh)
    vh = vals.reshape(B, kproj, heads, dh).transpose(0, 2, 1, 3).reshape(B * heads, kproj, dh)

    out = pallas_attention(qh.astype(jnp.bfloat16), kh.astype(jnp.bfloat16),
                           vh.astype(jnp.bfloat16), scale=float(dh) ** -0.5)
    out = out.reshape(B, heads, n, dh).transpose(0, 2, 1, 3).reshape(B * n, d)
    out = pallas_matmul(out, p["wo"]) + p["wo_b"]
    return out.reshape(B, n, d)


def feed_forward(x, p):
    B, n, d = x.shape
    xf = x.reshape(B * n, d)
    h = pallas_matmul(xf, p["w1"]) + p["b1"]
    h = jax.nn.gelu(h, approximate=False)
    o = pallas_matmul(h, p["w2"]) + p["b2"]
    return o.reshape(B, n, d)


def vit_forward(x_nchw, p):
    B = x_nchw.shape[0]
    ps, hp, dim = 12, 7, 128
    # Rearrange 'b c (h p1) (w p2) -> b (h w) (p1 p2 c)'
    patches = x_nchw.reshape(B, 3, hp, ps, hp, ps)
    patches = patches.transpose(0, 2, 4, 3, 5, 1).reshape(B, hp * hp, ps * ps * 3)
    tok = pallas_matmul(patches.reshape(B * hp * hp, -1), p["patch_w"]) + p["patch_b"]
    tok = tok.reshape(B, hp * hp, dim)
    cls = jnp.broadcast_to(p["cls"], (B, 1, dim))
    x = jnp.concatenate([cls, tok], axis=1) + p["pos"]
    for lp in p["layers"]:
        x = linformer_attn(layer_norm(x, lp["ln1_g"], lp["ln1_b"]),
                           lp["attn"], heads=4, kproj=64) + x
        x = feed_forward(layer_norm(x, lp["ln2_g"], lp["ln2_b"]), lp["ff"]) + x
    x = x[:, 0]                                          # cls pooling
    x = layer_norm(x, p["head_ln_g"], p["head_ln_b"])
    return pallas_matmul(x, p["head_w"]) + p["head_b"]   # (B, 3)


# ----------------------------------------------------------------------------
# Full ResNet forward
# ----------------------------------------------------------------------------
def resnet_forward(params, x_nchw):
    x_vit = vit_forward(x_nchw, params["vit"])           # (B, 3)

    x = jnp.transpose(x_nchw, (0, 2, 3, 1))              # NHWC
    B = x.shape[0]
    out, Ho, Wo = conv2d_im2col(x, params["conv1_w"], stride=1, padding=1)
    out = pallas_bn(out, params["bn1_g"], params["bn1_b"], relu=True)
    out = out.reshape(B, Ho, Wo, 64)

    for p_blk, s in zip(params["layer2"], _LAYER_STRIDES):
        out = basic_block(out, p_blk, s)
    for p_blk, s in zip(params["layer3"], _LAYER_STRIDES):
        out = basic_block(out, p_blk, s)

    B, H, W, C = out.shape
    pooled = pallas_avgpool(out.reshape(B, H * W, C))    # (B, 256)
    return jnp.concatenate([pooled, x_vit], axis=1)      # (B, 259)


# ----------------------------------------------------------------------------
# Deterministic parameter init
# ----------------------------------------------------------------------------
def init_params(key):
    keys = iter(jax.random.split(key, 512))
    nk = lambda: next(keys)

    def conv_w(o, i, kh, kw):
        fan_out = o * kh * kw                            # kaiming_normal, fan_out, relu
        return jax.random.normal(nk(), (o, i, kh, kw), jnp.float32) * math.sqrt(2.0 / fan_out)

    def linear(i, o, bias=True):
        bound = i ** -0.5
        w = jax.random.uniform(nk(), (i, o), jnp.float32, -bound, bound)
        if not bias:
            return w
        b = jax.random.uniform(nk(), (o,), jnp.float32, -bound, bound)
        return w, b

    def bn(c):
        return jnp.ones((c,), jnp.float32), jnp.zeros((c,), jnp.float32)

    params = {}
    params["conv1_w"] = conv_w(64, 3, 7, 7)
    params["bn1_g"], params["bn1_b"] = bn(64)

    def block_params(inp, planes, stride):
        p = {}
        p["conv1_w"] = conv_w(planes, inp, 3, 3)
        p["bn1_g"], p["bn1_b"] = bn(planes)
        p["conv2_w"] = conv_w(planes, planes, 3, 3)
        p["bn2_g"], p["bn2_b"] = bn(planes)
        if stride != 1 or inp != planes:
            p["sc_conv_w"] = conv_w(planes, inp, 1, 1)
            p["sc_bn_g"], p["sc_bn_b"] = bn(planes)
        return p

    in_planes = 64
    layer2 = []
    for s in _LAYER_STRIDES:
        layer2.append(block_params(in_planes, 128, s))
        in_planes = 128
    layer3 = []
    for s in _LAYER_STRIDES:
        layer3.append(block_params(in_planes, 256, s))
        in_planes = 256
    params["layer2"], params["layer3"] = layer2, layer3

    dim, heads, kproj, depth, seq = 128, 4, 64, 6, 50
    vit = {}
    vit["patch_w"], vit["patch_b"] = linear(432, dim)
    vit["cls"] = jax.random.normal(nk(), (1, 1, dim), jnp.float32)
    vit["pos"] = jax.random.normal(nk(), (1, seq, dim), jnp.float32)
    layers = []
    for _ in range(depth):
        lp = {"ln1_g": jnp.ones((dim,), jnp.float32), "ln1_b": jnp.zeros((dim,), jnp.float32),
              "ln2_g": jnp.ones((dim,), jnp.float32), "ln2_b": jnp.zeros((dim,), jnp.float32)}
        pb = kproj ** -0.5
        attn = {}
        attn["wqkv"] = jnp.concatenate(
            [linear(dim, dim, bias=False) for _ in range(3)], axis=1)         # (128, 384)
        attn["proj_kv"] = jnp.concatenate(
            [jax.random.uniform(nk(), (seq, kproj), jnp.float32, -pb, pb)
             for _ in range(2)], axis=1)                                       # (50, 128)
        attn["wo"], attn["wo_b"] = linear(dim, dim)
        lp["attn"] = attn
        ff = {}
        ff["w1"], ff["b1"] = linear(dim, dim * 4)
        ff["w2"], ff["b2"] = linear(dim * 4, dim)
        lp["ff"] = ff
        layers.append(lp)
    vit["layers"] = layers
    vit["head_ln_g"], vit["head_ln_b"] = jnp.ones((dim,), jnp.float32), jnp.zeros((dim,), jnp.float32)
    vit["head_w"], vit["head_b"] = linear(dim, 3)
    params["vit"] = vit
    return params


if __name__ == "__main__":
    root = jax.random.PRNGKey(0)
    k_x, k_p = jax.random.split(root)
    # ViT(image_size=84, patch_size=12, channels=3) forces the input shape.
    x = jax.random.normal(k_x, (2, 3, 84, 84), jnp.float32)
    params = init_params(k_p)

    fwd = jax.jit(resnet_forward)
    out = jax.block_until_ready(fwd(params, x))
    assert out.shape == (2, 259), out.shape
    assert bool(jnp.all(jnp.isfinite(out)))
    print("KERNEL_OK")
</pallas_src>

<mosaic_0001>
module attributes {stable_mosaic.version = 11 : i64} {
  func.func @_matmul_kernel(%arg0: i32, %arg1: i32, %arg2: i32, %arg3: memref<104x432xbf16, #tpu.memory_space<vmem>>, %arg4: memref<432x128xbf16, #tpu.memory_space<vmem>>, %arg5: memref<104x128xf32, #tpu.memory_space<vmem>>, %arg6: memref<104x128xf32, #tpu.memory_space<vmem>>) attributes {dimension_semantics = [#tpu.dimension_semantics<parallel>, #tpu.dimension_semantics<parallel>, #tpu.dimension_semantics<arbitrary>], iteration_bounds = array<i64: 1, 1, 1>, scalar_prefetch = 0 : i64, scratch_operands = 1 : i64, tpu.core_type = #tpu.core_type<tc>, window_params = [{transform_indices = @transform_0, window_bounds = array<i64: 104, 432>}, {transform_indices = @transform_1, window_bounds = array<i64: 432, 128>}, {transform_indices = @transform_2, window_bounds = array<i64: 104, 128>}]} {
    %c0_i32 = arith.constant 0 : i32
    %0 = arith.cmpi eq, %arg2, %c0_i32 : i32
    %1 = arith.extui %0 : i1 to i32
    %c0_i32_0 = arith.constant 0 : i32
    %2 = arith.cmpi ne, %1, %c0_i32_0 : i32
    scf.if %2 {
      %cst_10 = arith.constant 0.000000e+00 : f32
      %12 = vector.broadcast %cst_10 : f32 to vector<104x128xf32>
      %c0_11 = arith.constant 0 : index
      %c0_12 = arith.constant 0 : index
      %13 = vector.load %arg6[%c0_11, %c0_12] : memref<104x128xf32, #tpu.memory_space<vmem>>, vector<104x128xf32>
      tpu.vector_store %arg6[%c0_11, %c0_12], %12 {strides = array<i32>} : memref<104x128xf32, #tpu.memory_space<vmem>>, vector<104x128xf32>,
    } else {
    }
    %c0 = arith.constant 0 : index
    %c0_1 = arith.constant 0 : index
    %3 = vector.load %arg6[%c0, %c0_1] : memref<104x128xf32, #tpu.memory_space<vmem>>, vector<104x128xf32>
    %c0_2 = arith.constant 0 : index
    %c0_3 = arith.constant 0 : index
    %4 = vector.load %arg3[%c0_2, %c0_3] : memref<104x432xbf16, #tpu.memory_space<vmem>>, vector<104x432xbf16>
    %c0_4 = arith.constant 0 : index
    %c0_5 = arith.constant 0 : index
    %5 = vector.load %arg4[%c0_4, %c0_5] : memref<432x128xbf16, #tpu.memory_space<vmem>>, vector<432x128xbf16>
    %cst = arith.constant dense<0.000000e+00> : vector<104x128xf32>
    %6 = tpu.matmul %4, %5, %cst {dimension_numbers = #tpu.dot_dimension_numbers<[1], [0], [0], [1], [0, 0, 1, 1], [], []>} : vector<104x432xbf16>, vector<432x128xbf16>, vector<104x128xf32> -> vector<104x128xf32>
    %7 = arith.addf %3, %6 : vector<104x128xf32>
    %c0_6 = arith.constant 0 : index
    %c0_7 = arith.constant 0 : index
    %8 = vector.load %arg6[%c0_6, %c0_7] : memref<104x128xf32, #tpu.memory_space<vmem>>, vector<104x128xf32>
    tpu.vector_store %arg6[%c0_6, %c0_7], %7 {strides = array<i32>} : memref<104x128xf32, #tpu.memory_space<vmem>>, vector<104x128xf32>,
    %c0_i32_8 = arith.constant 0 : i32
    %9 = arith.cmpi eq, %arg2, %c0_i32_8 : i32
    %10 = arith.extui %9 : i1 to i32
    %c0_i32_9 = arith.constant 0 : i32
    %11 = arith.cmpi ne, %10, %c0_i32_9 : i32
    scf.if %11 {
      %c0_10 = arith.constant 0 : index
      %c0_11 = arith.constant 0 : index
      %12 = vector.load %arg6[%c0_10, %c0_11] : memref<104x128xf32, #tpu.memory_space<vmem>>, vector<104x128xf32>
      %c0_12 = arith.constant 0 : index
      %c0_13 = arith.constant 0 : index
      %13 = vector.load %arg5[%c0_12, %c0_13] : memref<104x128xf32, #tpu.memory_space<vmem>>, vector<104x128xf32>
      tpu.vector_store %arg5[%c0_12, %c0_13], %12 {strides = array<i32>} : memref<104x128xf32, #tpu.memory_space<vmem>>, vector<104x128xf32>,
    } else {
    }
    return
  }
  func.func @transform_0(%arg0: i32, %arg1: i32, %arg2: i32) -> (i32, i32) {
    %c0_i32 = arith.constant 0 : i32
    return %arg0, %arg2 : i32, i32
  }
  func.func @transform_1(%arg0: i32, %arg1: i32, %arg2: i32) -> (i32, i32) {
    %c0_i32 = arith.constant 0 : i32
    return %arg2, %arg1 : i32, i32
  }
  func.func @transform_2(%arg0: i32, %arg1: i32, %arg2: i32) -> (i32, i32) {
    %c0_i32 = arith.constant 0 : i32
    return %arg0, %arg1 : i32, i32
  }
}

</mosaic_0001>

<bundles_post_ra>
// kernel: pallas_matmul.1
= control target key start
LH: loop header
LB: loop body
LE: loop exit
PB: predicated region body
PF: predicated region fallthrough
CT: control target
= control target key end

     0   :  { %v896_v1 = vmov 0   ;;  %vm412_vm0 = vcmask 392192   ;;  %s1104_s0 = inlined_call_operand.vmem [shape: bf16[104,432], index: 0, kind: input, shape index: {}]   ;;  %s1105_s1 = inlined_call_operand.vmem [shape: bf16[432,128], index: 1, kind: input, shape index: {}]   ;;  %s1106_s2 = inlined_call_operand.hbm [shape: f32[104,128], index: 2, kind: output, shape index: {}]  }
   0x1   :  { %v805_v0 = vld [vmem:[%s1105_s1 + $0x80] sm:$0xff]   ;;  %522 = vmatprep.subr.bf16.mxu1 %v896_v1  ;;  %v806_v2 = vld [vmem:[%s1105_s1 + $0x88] sm:$0xff]   ;;  %v809_v5 = vld [vmem:[%s1105_s1 + $0x90] sm:$0xff]  }
   0x2   :  { %523 = vmatpush1.bf16.msra.mxu1 %v805_v0  ;;  %v807_v3 = vld [vmem:[%s1105_s1 + $0x40] sm:$0xff]   ;;  %v810_v6 = vld [vmem:[%s1105_s1 + $0x48] sm:$0xff]   ;;  %v813_v8 = vld [vmem:[%s1105_s1 + $0x50] sm:$0xff]  }
   0x3   :  { %524 = vmatprep.subr.bf16.mxu1 %v896_v1  ;;  %v808_v4 = vld [vmem:[%s1105_s1] sm:$0xff]   ;;  %743 = vmatprep.subr.bf16.mxu0 %v807_v3  ;;  %v811_v7 = vld [vmem:[%s1105_s1 + $0x8] sm:$0xff]   ;;  %v814_v9 = vld [vmem:[%s1105_s1 + $0x10] sm:$0xff]  }
   0x4   :  { %744 = vmatpush3.bf16.msra.mxu0 %v808_v4  ;;  %v812_v10 = vld [vmem:[%s1105_s1 + $0x98] sm:$0xff]   ;;  %v815_v12 = vld [vmem:[%s1105_s1 + $0xa0] sm:$0xff]   ;;  %v818_v15 = vld [vmem:[%s1105_s1 + $0xa8] sm:$0xff]  }
   0x5   :  { %745 = vmatprep.subr.bf16.mxu0 %v810_v6  ;;  %v816_v11 = vld [vmem:[%s1105_s1 + $0x58] sm:$0xff]   ;;  %v819_v14 = vld [vmem:[%s1105_s1 + $0x60] sm:$0xff]   ;;  %v822_v17 = vld [vmem:[%s1105_s1 + $0x68] sm:$0xff]  }
   0x6   :  { %525 = vmatpush1.bf16.msra.mxu1 %v806_v2  ;;  %v817_v13 = vld [vmem:[%s1105_s1 + $0x18] sm:$0xff]   ;;  %v820_v16 = vld [vmem:[%s1105_s1 + $0x20] sm:$0xff]   ;;  %v821_v18 = vld [vmem:[%s1105_s1 + $0xb0] sm:$0xff]  }
   0x7   :  { %526 = vmatprep.subr.bf16.mxu1 %v896_v1  ;;  %v823_v19 = vld [vmem:[%s1105_s1 + $0x28] sm:$0xff]   ;;  %v825_v20 = vld [vmem:[%s1105_s1 + $0x70] sm:$0xff]   ;;  %v824_v21 = vld [vmem:[%s1105_s1 + $0xb8] sm:$0xff]  }
   0x8   :  { %746 = vmatpush3.bf16.msra.mxu0 %v811_v7  ;;  %v826_v22 = vld [vmem:[%s1105_s1 + $0x30] sm:$0xff]   ;;  %v828_v23 = vld [vmem:[%s1105_s1 + $0x78] sm:$0xff]   ;;  %v827_v27 = vld [vmem:[%s1105_s1 + $0xc0] sm:$0xff]  }
   0x9   :  { %747 = vmatprep.subr.bf16.mxu0 %v813_v8  ;;  %v832_v24 = vld [vmem:[%s1104_s0 + $0x4] ss:$16 sps:$4 sm:$0xff]   ;;  %v829_v25 = vld [vmem:[%s1105_s1 + $0x38] sm:$0xff]   ;;  %v830_v28 = vld [vmem:[%s1104_s0] ss:$16 sps:$4 sm:$0xff]  }
   0xa   :  { %527 = vmatpush1.bf16.msra.mxu1 %v809_v5  ;;  %466 = vmatprep.mubr.bf16.mxu0 %v832_v24  ;;  %v837_v26 = vld [vmem:[%s1104_s0 + $0xc] ss:$16 sps:$4 sm:$0xff]   ;;  %v838_v29 = vld [vmem:[%s1104_s0 + $0x24] ss:$16 sps:$4 sm:$0xff]   ;;  %v840_v32 = vld [vmem:[%s1104_s0 + $0x20] ss:$16 sps:$4 sm:$0xff]  }
   0xb   :  { %528 = vmatprep.subr.bf16.mxu1 %v896_v1  ;;  %736 = vmatprep.mubr.msk.bf16.mxu1 %vm412_vm0, %v837_v26  ;;  %v833_v30 = vld [vmem:[%s1105_s1 + $0xc8] sm:$0xff]   ;;  %v834_v31 = vld [vmem:[%s1105_s1 + $0xd0] sm:$0xff]  }
   0xc   :  { %748 = vmatpush3.bf16.msra.mxu0 %v814_v9  ;;  %v835_v33 = vld [vmem:[%s1104_s0 + $0x8] ss:$16 sps:$4 sm:$0xff]   ;;  %v844_v34 = vld [vmem:[%s1104_s0 + $0x44] ss:$16 sps:$4 sm:$0xff]   ;;  %v841_v35 = vld [vmem:[%s1104_s0 + $0x2c] ss:$16 sps:$4 sm:$0xff]  }
   0xd   :  { %749 = vmatprep.subr.bf16.mxu0 %v816_v11 }
   0xe   :  { %529 = vmatpush1.bf16.msra.mxu1 %v812_v10 }
   0xf   :  { %530 = vmatprep.subr.bf16.mxu1 %v896_v1 }
  0x10   :  { %750 = vmatpush3.bf16.msra.mxu0 %v817_v13 }
  0x11   :  { %751 = vmatprep.subr.bf16.mxu0 %v819_v14 }
  0x12   :  { %531 = vmatpush1.bf16.msra.mxu1 %v815_v12 }
  0x13   :  { %532 = vmatprep.subr.bf16.mxu1 %v896_v1 }
  0x14   :  { %752 = vmatpush3.bf16.msra.mxu0 %v820_v16 }
  0x15   :  { %753 = vmatprep.subr.bf16.mxu0 %v822_v17 }
  0x16   :  { %533 = vmatpush1.bf16.msra.mxu1 %v818_v15 }
  0x17   :  { %534 = vmatprep.subr.bf16.mxu1 %v896_v1 }
  0x18   :  { %754 = vmatpush3.bf16.msra.mxu0 %v823_v19 }
  0x19   :  { %755 = vmatprep.subr.bf16.mxu0 %v825_v20 }
  0x1a   :  { %535 = vmatpush1.bf16.msra.mxu1 %v821_v18 }
  0x1b   :  { %536 = vmatprep.subr.bf16.mxu1 %v896_v1 }
  0x1c   :  { %756 = vmatpush3.bf16.msra.mxu0 %v826_v22 }
  0x1d   :  { %757 = vmatprep.subr.bf16.mxu0 %v828_v23 }
  0x1e   :  { %537 = vmatpush1.bf16.msra.mxu1 %v824_v21 }
  0x1f   :  { %538 = vmatprep.subr.bf16.mxu1 %v896_v1 }
  0x20   :  { %758 = vmatpush3.bf16.msra.mxu0 %v829_v25 }
  0x22   :  { %539 = vmatpush1.bf16.msra.mxu1 %v827_v27 }
  0x23   :  { %540 = vmatprep.subr.bf16.mxu1 %v896_v1  ;;  %467 = vmatmul.mubr.bf16.vlgmr.msra.gmra.mrb[0].mxu0 %v830_v28 }
  0x24   :  { %474 = vmatprep.mubr.bf16.mxu0 %v838_v29 }
  0x26   :  { %541 = vmatpush1.bf16.msra.mxu1 %v833_v30 }
  0x27   :  { %542 = vmatprep.subr.bf16.mxu1 %v896_v1 }
  0x2a   :  { %543 = vmatpush1.bf16.msra.mxu1 %v834_v31 }
  0x2b   :  { %7 = vsyncpa [#allocation4], 0  ;;  %475 = vmatmul.mubr.bf16.gmra.mrb[4].mxu0 %v840_v32  ;;  %v846_v36 = vld [vmem:[%s1104_s0 + $0x40] ss:$16 sps:$4 sm:$0xff]   ;;  %v843_v37 = vld [vmem:[%s1104_s0 + $0x28] ss:$16 sps:$4 sm:$0xff]  }
  0x2c   :  { %482 = vmatprep.mubr.bf16.mxu0 %v844_v34  ;;  %v850_v38 = vld [vmem:[%s1104_s0 + $0x64] ss:$16 sps:$4 sm:$0xff]   ;;  %v847_v39 = vld [vmem:[%s1104_s0 + $0x4c] ss:$16 sps:$4 sm:$0xff]   ;;  %v852_v40 = vld [vmem:[%s1104_s0 + $0x60] ss:$16 sps:$4 sm:$0xff]  }
  0x2d   :  { %555 = vmatmul.mubr.bf16.vlgmr.msra.gmra.mrb[0].mxu1 %v835_v33  ;;  %v849_v41 = vld [vmem:[%s1104_s0 + $0x48] ss:$16 sps:$4 sm:$0xff]   ;;  %v856_v42 = vld [vmem:[%s1104_s0 + $0x84] ss:$16 sps:$4 sm:$0xff]   ;;  %v853_v43 = vld [vmem:[%s1104_s0 + $0x6c] ss:$16 sps:$4 sm:$0xff]  }
  0x2e   :  { %737 = vmatprep.mubr.msk.bf16.mxu1 %vm412_vm0, %v841_v35  ;;  %v858_v44 = vld [vmem:[%s1104_s0 + $0x80] ss:$16 sps:$4 sm:$0xff]   ;;  %v855_v45 = vld [vmem:[%s1104_s0 + $0x68] ss:$16 sps:$4 sm:$0xff]   ;;  %v862_v46 = vld [vmem:[%s1104_s0 + $0xa4] ss:$16 sps:$4 sm:$0xff]  }
  0x2f   :  { %v859_v47 = vld [vmem:[%s1104_s0 + $0x8c] ss:$16 sps:$4 sm:$0xff]   ;;  %v67_v48 = vld [vmem:[%s1104_s0 + $0xc0] sm:$0xff]  ;;  %v861_v50 = vld [vmem:[%s1104_s0 + $0x88] ss:$16 sps:$4 sm:$0xff]  }
  0x30   :  { %v864_v49 = vld [vmem:[%s1104_s0 + $0xa0] ss:$16 sps:$4 sm:$0xff]   ;;  %v706_v51 = vcombine.high %v67_v48, %v67_v48  ;;  %v865_v52 = vld [vmem:[%s1104_s0 + $0xac] ss:$16 sps:$4 sm:$0xff]   ;;  %v705_v54 = vcombine.low %v67_v48, %v67_v48  ;;  %v867_v55 = vld [vmem:[%s1104_s0 + $0xa8] ss:$16 sps:$4 sm:$0xff]  }
  0x31   :  { %v68_v53 = vld [vmem:[%s1104_s0 + $0xc8] sm:$0xff]  ;;  %s897_s0 = smov [#allocation3]  }
  0x32   :  { %v708_v56 = vcombine.high %v68_v53, %v68_v53  ;;  %v707_v57 = vcombine.low %v68_v53, %v68_v53  ;;  %s670_s29 = sshll.u32 %s897_s0, 4  ;;  %s671_s29 = int_to_ptr.vmem [resolvable:$true] %s670_s29 }
  0x33   :  { %483 = vmatmul.mubr.bf16.gmra.mrb[8].mxu0 %v846_v36  ;;  %s872_s30 = scalar_lea.vmem %s671_s29, 1664  ;;  %p877_p1 = scmp.lt.s32.totalorder %s671_s29, %s671_s29 }
  0x34   :  { %490 = vmatprep.mubr.bf16.mxu0 %v850_v38  ;;  %p873_p0 = scmp.ne.s32.totalorder %s671_s29, %s872_s30  ;;  %p878_p2 = scmp.lt.s32.totalorder %s872_s30, %s872_s30 }
  0x35   :  { %563 = vmatmul.mubr.bf16.gmra.mrb[4].mxu1 %v843_v37 }
  0x36   :  { %738 = vmatprep.mubr.msk.bf16.mxu1 %vm412_vm0, %v847_v39  ;;  %p879_p3 = por %p878_p2, %p877_p1 }
  0x38   :  { %p880_p4 = pnand %p879_p3, %p873_p0 }
  0x3b   :  { %491 = vmatmul.mubr.bf16.gmra.mrb[12].mxu0 %v852_v40 }
  0x3c   :  { %498 = vmatprep.mubr.bf16.mxu0 %v856_v42 }
  0x3d   :  { %571 = vmatmul.mubr.bf16.gmra.mrb[8].mxu1 %v849_v41 }
  0x3e   :  { %739 = vmatprep.mubr.msk.bf16.mxu1 %vm412_vm0, %v853_v43 }
  0x43   :  { %499 = vmatmul.mubr.bf16.gmra.mrb[16].mxu0 %v858_v44 }
  0x44   :  { %506 = vmatprep.mubr.bf16.mxu0 %v862_v46 }
  0x45   :  { %579 = vmatmul.mubr.bf16.gmra.mrb[12].mxu1 %v855_v45 }
  0x46   :  { %740 = vmatprep.mubr.msk.bf16.mxu1 %vm412_vm0, %v859_v47 }
  0x4b   :  { %507 = vmatmul.mubr.bf16.gmra.mrb[20].mxu0 %v864_v49 }
  0x4c   :  { %514 = vmatprep.mubr.bf16.mxu0 %v706_v51 }
  0x4d   :  { %587 = vmatmul.mubr.bf16.gmra.mrb[16].mxu1 %v861_v50 }
  0x4e   :  { %741 = vmatprep.mubr.msk.bf16.mxu1 %vm412_vm0, %v865_v52 }
  0x53   :  { %515 = vmatmul.mubr.bf16.gmra.mrb[24].mxu0 %v705_v54 }
  0x55   :  { %595 = vmatmul.mubr.bf16.gmra.mrb[20].mxu1 %v867_v55 }
  0x56   :  { %742 = vmatprep.mubr.msk.bf16.mxu1 %vm412_vm0, %v708_v56 }
  0x5d   :  { %603 = vmatmul.mubr.bf16.gmra.mrb[24].mxu1 %v707_v57 }
  0xf6   :  { %v759_v58 = vpop.f32.mrb[0].mxu0 }
  0xf7   :  { %v760_v59 = vpop.f32.mrb[1].mxu0 }
  0xf8   :  { %v761_v60 = vadd.f32 %v760_v59, %v759_v58  ;;  %v762_v61 = vpop.f32.mrb[2].mxu0 }
  0xf9   :  { %v763_v62 = vpop.f32.mrb[3].mxu0 }
  0xfa   :  { %v764_v63 = vadd.f32 %v763_v62, %v762_v61 }
  0xfe   :  { %v765_v0 = vpop.f32.mrb[4].mxu0 }
  0xff   :  { %v766_v2 = vpop.f32.mrb[5].mxu0 }
 0x100   :  { %v556_v1 = vpop.f32.mrb[0].mxu1  ;;  %v767_v5 = vadd.f32 %v766_v2, %v765_v0  ;;  %v768_v6 = vpop.f32.mrb[6].mxu0 }
 0x101   :  { %v557_v3 = vadd.f32 %v761_v60, %v556_v1  ;;  %v558_v4 = vpop.f32.mrb[1].mxu1  ;;  %v769_v8 = vpop.f32.mrb[7].mxu0 }
 0x102   :  { %v559_v7 = vpop.f32.mrb[2].mxu1  ;;  %v770_v11 = vadd.f32 %v769_v8, %v768_v6 }
 0x103   :  { %652 = vst [vmem:[#allocation3] sm:$0xff] %v557_v3  ;;  %v560_v9 = vadd.f32 %v764_v63, %v559_v7  ;;  %v561_v10 = vpop.f32.mrb[3].mxu1 }
 0x105   :  { %653 = vst [vmem:[#allocation3 + $0x8] sm:$0xff] %v560_v9 }
 0x106   :  { %v771_v12 = vpop.f32.mrb[8].mxu0 }
 0x107   :  { %v772_v14 = vpop.f32.mrb[9].mxu0 }
 0x108   :  { %v564_v13 = vpop.f32.mrb[4].mxu1  ;;  %v773_v17 = vadd.f32 %v772_v14, %v771_v12  ;;  %v774_v18 = vpop.f32.mrb[10].mxu0 }
 0x109   :  { %v565_v15 = vadd.f32 %v767_v5, %v564_v13  ;;  %v566_v16 = vpop.f32.mrb[5].mxu1  ;;  %v775_v20 = vpop.f32.mrb[11].mxu0 }
 0x10a   :  { %v567_v19 = vpop.f32.mrb[6].mxu1  ;;  %v776_v23 = vadd.f32 %v775_v20, %v774_v18 }
 0x10b   :  { %654 = vst [vmem:[#allocation3 + $0x10] sm:$0xff] %v565_v15  ;;  %v568_v21 = vadd.f32 %v770_v11, %v567_v19  ;;  %v569_v22 = vpop.f32.mrb[7].mxu1 }
 0x10d   :  { %655 = vst [vmem:[#allocation3 + $0x18] sm:$0xff] %v568_v21 }
 0x10e   :  { %v777_v24 = vpop.f32.mrb[12].mxu0 }
 0x10f   :  { %v778_v26 = vpop.f32.mrb[13].mxu0 }
 0x110   :  { %v572_v25 = vpop.f32.mrb[8].mxu1  ;;  %v779_v29 = vadd.f32 %v778_v26, %v777_v24  ;;  %v780_v30 = vpop.f32.mrb[14].mxu0 }
 0x111   :  { %v573_v27 = vadd.f32 %v773_v17, %v572_v25  ;;  %v574_v28 = vpop.f32.mrb[9].mxu1  ;;  %v781_v32 = vpop.f32.mrb[15].mxu0 }
 0x112   :  { %v575_v31 = vpop.f32.mrb[10].mxu1  ;;  %v782_v35 = vadd.f32 %v781_v32, %v780_v30 }
 0x113   :  { %656 = vst [vmem:[#allocation3 + $0x20] sm:$0xff] %v573_v27  ;;  %v576_v33 = vadd.f32 %v776_v23, %v575_v31  ;;  %v577_v34 = vpop.f32.mrb[11].mxu1 }
 0x115   :  { %657 = vst [vmem:[#allocation3 + $0x28] sm:$0xff] %v576_v33 }
 0x116   :  { %v783_v36 = vpop.f32.mrb[16].mxu0 }
 0x117   :  { %v784_v38 = vpop.f32.mrb[17].mxu0 }
 0x118   :  { %v580_v37 = vpop.f32.mrb[12].mxu1  ;;  %v785_v41 = vadd.f32 %v784_v38, %v783_v36  ;;  %v786_v42 = vpop.f32.mrb[18].mxu0 }
 0x119   :  { %v581_v39 = vadd.f32 %v779_v29, %v580_v37  ;;  %v582_v40 = vpop.f32.mrb[13].mxu1  ;;  %v787_v44 = vpop.f32.mrb[19].mxu0 }
 0x11a   :  { %v583_v43 = vpop.f32.mrb[14].mxu1  ;;  %v788_v47 = vadd.f32 %v787_v44, %v786_v42 }
 0x11b   :  { %658 = vst [vmem:[#allocation3 + $0x30] sm:$0xff] %v581_v39  ;;  %v584_v45 = vadd.f32 %v782_v35, %v583_v43  ;;  %v585_v46 = vpop.f32.mrb[15].mxu1 }
 0x11d   :  { %659 = vst [vmem:[#allocation3 + $0x38] sm:$0xff] %v584_v45 }
 0x11e   :  { %v789_v48 = vpop.f32.mrb[20].mxu0 }
 0x11f   :  { %v790_v50 = vpop.f32.mrb[21].mxu0 }
 0x120   :  { %v588_v49 = vpop.f32.mrb[16].mxu1  ;;  %v791_v53 = vadd.f32 %v790_v50, %v789_v48  ;;  %v792_v54 = vpop.f32.mrb[22].mxu0 }
 0x121   :  { %v589_v51 = vadd.f32 %v785_v41, %v588_v49  ;;  %v590_v52 = vpop.f32.mrb[17].mxu1  ;;  %v793_v56 = vpop.f32.mrb[23].mxu0 }
 0x122   :  { %v591_v55 = vpop.f32.mrb[18].mxu1  ;;  %v794_v59 = vadd.f32 %v793_v56, %v792_v54 }
 0x123   :  { %660 = vst [vmem:[#allocation3 + $0x40] sm:$0xff] %v589_v51  ;;  %v592_v57 = vadd.f32 %v788_v47, %v591_v55  ;;  %v593_v58 = vpop.f32.mrb[19].mxu1 }
 0x125   :  { %661 = vst [vmem:[#allocation3 + $0x48] sm:$0xff] %v592_v57 }
 0x126   :  { %v795_v60 = vpop.f32.mrb[24].mxu0 }
 0x127   :  { %v796_v62 = vpop.f32.mrb[25].mxu0 }
 0x128   :  { %v596_v61 = vpop.f32.mrb[20].mxu1  ;;  %v797_v1 = vadd.f32 %v796_v62, %v795_v60  ;;  %v798_v2 = vpop.f32.mrb[26].mxu0 }
 0x129   :  { %v597_v63 = vadd.f32 %v791_v53, %v596_v61  ;;  %v598_v0 = vpop.f32.mrb[21].mxu1  ;;  %v799_v4 = vpop.f32.mrb[27].mxu0 }
 0x12a   :  { %v599_v3 = vpop.f32.mrb[22].mxu1 }
 0x12b   :  { %662 = vst [vmem:[#allocation3 + $0x50] sm:$0xff] %v597_v63  ;;  %v600_v5 = vadd.f32 %v794_v59, %v599_v3  ;;  %v601_v6 = vpop.f32.mrb[23].mxu1 }
 0x12d   :  { %663 = vst [vmem:[#allocation3 + $0x58] sm:$0xff] %v600_v5 }
 0x130   :  { %v604_v7 = vpop.f32.mrb[24].mxu1 }
 0x131   :  { %v605_v8 = vadd.f32 %v797_v1, %v604_v7  ;;  %v606_v9 = vpop.f32.mrb[25].mxu1 }
 0x132   :  { %v607_v10 = vpop.f32.mrb[26].mxu1 }
 0x133   :  { %664 = vst [vmem:[#allocation3 + $0x60] sm:$0xff] %v605_v8  ;;  %v608_v11 = vpop.f32.mrb[27].mxu1 }
 0x134   :  { %883 = shalt.err (!%p880_p4)
}
 0x135   :  { %s884_s5 = scalar_lea.hbm %s1106_s2, 1664 }
 0x136   :  { %p885_p5 = scmp.ne.s32.totalorder %s1106_s2, %s884_s5  ;;  %p888_p6 = scmp.lt.u32.totalorder %s884_s5, %s1106_s2 }
 0x138   :  { %p890_p7 = pnand %p888_p6, %p885_p5 }
 0x13a   :  { %893 = shalt.err (!%p890_p7)
}
 0x13b   :  { %s898_s10 = smov 128   ;;  %s899_s11 = smov 8  }
 0x13c   :  { %676 = dma.vmem_to_hbm [thread:$0]  %s671_s29, 1664, %s1106_s2, [#allocation4], %s898_s10, %s898_s10, %s899_s11  }
 0x13d   :  { %894 = dma.done.wait [#allocation4], 1664  }
 0x13e   :  { %895 = vsyncadd [#allocation4], 4294965632 }
 0x13f   :  { %680 = vsyncpa [#allocation4], 1 }

</bundles_post_ra>
